<compile_context>
chip_gen: v6e
topology: v6e:2x2x1
jax: 0.10.0
libtpu: 0.0.40
codegen_flags: <defaults>
</compile_context>

<pallas_src>
import jax
import jax.numpy as jnp
from jax import lax
from jax.experimental import pallas as pl
from jax.experimental.pallas import tpu as pltpu

SELU_SCALE = 1.0507009873554804934193349852946
SELU_ALPHA = 1.6732632423543772848170429916717
LN_EPS = 1e-5
LANE = 128
SUBLANE = 8


def _round_up(n, m):
    return ((n + m - 1) // m) * m


def _pad2(a, rows, cols):
    r, c = a.shape
    return jnp.pad(a, ((0, rows - r), (0, cols - c)))


def _padded_bytes(a):
    shape = a.shape
    if len(shape) == 1:
        shape = (1,) + tuple(shape)
    lead, r, c = shape[:-2], shape[-2], shape[-1]
    n = 1
    for d in lead:
        n *= int(d)
    return n * _round_up(int(r), SUBLANE) * _round_up(int(c), LANE) * a.dtype.itemsize


# ---------------------------------------------------------------------------
# Fused kernel factory (layer count / widths / tile sizes are static Python)
# ---------------------------------------------------------------------------
def _make_kernel(*, num_hidden, num_mid, hidden_true, count_col, tb, mm_dtype):
    inv_h = 1.0 / float(hidden_true) if hidden_true > 0 else 1.0

    def selu(y):
        # Dropout(p=0.0) is the identity. expm1(min(y,0)) avoids overflow in
        # the untaken positive branch.
        return SELU_SCALE * jnp.where(
            y > 0.0, y, SELU_ALPHA * jnp.expm1(jnp.minimum(y, 0.0)))

    def layer_norm(y, gamma, beta, mask):
        # True-width statistics. Padded lanes of y are exactly 0 so the mean
        # sum is unaffected; the centered values are masked so the two-pass
        # variance is exact (no E[y^2]-mu^2 cancellation). gamma/beta are 0 in
        # padded lanes -> padded lanes stay exactly 0.
        mu = jnp.sum(y, axis=-1, keepdims=True) * inv_h
        c = (y - mu) * mask
        var = jnp.sum(c * c, axis=-1, keepdims=True) * inv_h
        yn = (y - mu) * lax.rsqrt(var + LN_EPS)
        return yn * gamma + beta

    def kernel(batch_ref, x_ref, u_ref, *rest):
        params = rest[:-2]
        out_ref = rest[-2]
        seg_acc = rest[-1]

        b_blk = pl.program_id(0)
        n = pl.program_id(1)
        tn = x_ref.shape[1]

        # ---- scatter-sum partial for this N-chunk (one MXU contraction) ----
        @pl.when(n == 0)
        def _():
            seg_acc[...] = jnp.zeros_like(seg_acc)

        row_ids = lax.broadcasted_iota(jnp.int32, (tb, tn), 0) + b_blk * tb
        onehot = (batch_ref[...] == row_ids).astype(mm_dtype)       # (tb, tn)
        # x_ref is (Fr, tn) = [x^T ; ones ; 0-pad]; contract the lane dims of
        # both operands ("NT" matmul, same orientation as flash-attn qk).
        seg_acc[...] += lax.dot_general(
            onehot, x_ref[...],
            dimension_numbers=(((1,), (1,)), ((), ())),
            preferred_element_type=jnp.float32)                     # (tb, Fr)

        # ---- finalize: mean + full MLP, once per B-block ----
        @pl.when(n == pl.num_programs(1) - 1)
        def _():
            seg = seg_acc[...]
            counts = seg[:, count_col:count_col + 1]                # ones column
            inv = pl.reciprocal(jnp.maximum(counts, 1.0), approx=False)
            # padded feature columns are 0, counts column hits zero weight rows
            mean = (seg * inv).astype(mm_dtype)                     # (tb, Fr)
            u = u_ref[...]

            if num_hidden == 0:
                w_u, w_x, b = params
                out_ref[...] = (
                    jnp.dot(u, w_u[...], preferred_element_type=jnp.float32)
                    + jnp.dot(mean, w_x[...], preferred_element_type=jnp.float32)
                    + b[...])
                return

            w0_u, w0_x, v0 = params[0], params[1], params[2]
            idx = 3
            hp = v0.shape[-1]
            mask = (lax.broadcasted_iota(jnp.int32, (tb, hp), 1)
                    < hidden_true).astype(jnp.float32)

            # First hidden layer: concat [u | mean] folded into split weights.
            y = (jnp.dot(u, w0_u[...], preferred_element_type=jnp.float32)
                 + jnp.dot(mean, w0_x[...], preferred_element_type=jnp.float32)
                 + v0[0:1, :])
            h = layer_norm(selu(y), v0[1:2, :], v0[2:3, :], mask)

            # Remaining hidden layers: stacked weights, fori_loop (bounded live
            # ranges, single VMEM ref each for W and for b/gamma/beta).
            if num_mid > 0:
                w_mid, v_mid = params[idx], params[idx + 1]
                idx += 2

                def body(l, h):
                    w = w_mid[l]                                    # (Hp, Hp)
                    v = v_mid[l]                                    # (3, Hp)
                    y = jnp.dot(h.astype(mm_dtype), w,
                                preferred_element_type=jnp.float32) + v[0:1, :]
                    return layer_norm(selu(y), v[1:2, :], v[2:3, :], mask)

                h = lax.fori_loop(0, num_mid, body, h)

            w_out, b_out = params[idx], params[idx + 1]
            out_ref[...] = (jnp.dot(h.astype(mm_dtype), w_out[...],
                                    preferred_element_type=jnp.float32)
                            + b_out[...])

    return kernel


# ---------------------------------------------------------------------------
# Model wrapper
# ---------------------------------------------------------------------------
class GlobalMLPModel:
    """JAX/Pallas port of GlobalMLPModel. node_dim must be given because the
    PyTorch version uses lazy Linear(-1, ...)."""

    def __init__(self, global_dim, node_dim, hidden_dim=50, num_layers=1,
                 matmul_dtype=jnp.bfloat16, key=jax.random.PRNGKey(0)):
        assert num_layers >= 1
        self.global_dim = global_dim
        self.node_dim = node_dim
        self.hidden_dim = hidden_dim
        self.num_layers = num_layers
        self.num_hidden = num_layers - 1
        self.num_mid = max(self.num_hidden - 1, 0)
        self.mm_dtype = jnp.dtype(matmul_dtype)

        # ---- canonical (unpadded, f32) params, also used by the reference ----
        in_dim = global_dim + node_dim
        self.hidden_params = []
        for _ in range(self.num_hidden):
            key, kw, kb = jax.random.split(key, 3)
            w = 0.1 * jax.random.normal(kw, (in_dim, hidden_dim), jnp.float32)
            b = 0.1 * jax.random.normal(kb, (1, hidden_dim), jnp.float32)
            gamma = jnp.ones((1, hidden_dim), jnp.float32)   # LayerNorm default
            beta = jnp.zeros((1, hidden_dim), jnp.float32)
            self.hidden_params.append((w, b, gamma, beta))
            in_dim = hidden_dim
        key, kw, kb = jax.random.split(key, 3)
        self.out_w = 0.1 * jax.random.normal(kw, (in_dim, global_dim), jnp.float32)
        self.out_b = 0.1 * jax.random.normal(kb, (1, global_dim), jnp.float32)

        # ---- padded / split / stacked copies for the fused kernel ----
        self.fr = _round_up(node_dim + 1, SUBLANE)           # x features + counts row
        self.hidden_pad = _round_up(hidden_dim, LANE) if self.num_hidden else 0
        self.out_pad = _round_up(global_dim, LANE)
        G, Fx, Hp, Gp, Fr = global_dim, node_dim, self.hidden_pad, self.out_pad, self.fr
        mmd = self.mm_dtype

        kparams = []
        if self.num_hidden == 0:
            kparams += [
                _pad2(self.out_w[:G, :], G, Gp).astype(mmd),   # W_u
                _pad2(self.out_w[G:, :], Fr, Gp).astype(mmd),  # W_x (counts/pad rows = 0)
                _pad2(self.out_b, 1, Gp),                      # bias (f32)
            ]
        else:
            w0, b0, g0, be0 = self.hidden_params[0]
            kparams += [
                _pad2(w0[:G, :], G, Hp).astype(mmd),
                _pad2(w0[G:, :], Fr, Hp).astype(mmd),
                _pad2(jnp.concatenate([b0, g0, be0], axis=0), 3, Hp),  # (3,Hp) f32
            ]
            if self.num_mid > 0:
                w_stack = jnp.stack(
                    [_pad2(w, Hp, Hp) for (w, _, _, _) in self.hidden_params[1:]]
                ).astype(mmd)                                          # (Lm,Hp,Hp)
                v_stack = jnp.stack(
                    [_pad2(jnp.concatenate([b, g, be], axis=0), 3, Hp)
                     for (_, b, g, be) in self.hidden_params[1:]])     # (Lm,3,Hp) f32
                kparams += [w_stack, v_stack]
            kparams += [_pad2(self.out_w, Hp, Gp).astype(mmd),
                        _pad2(self.out_b, 1, Gp)]
        self.kernel_params = kparams

    # -- heuristics -------------------------------------------------------
    def _cost(self, B_pad, N_pad):
        G, Fr, Hp, Gp = self.global_dim, self.fr, self.hidden_pad, self.out_pad
        flops = 2 * B_pad * N_pad * Fr
        transc = 0
        if self.num_hidden == 0:
            flops += 2 * B_pad * (G + Fr) * Gp
        else:
            flops += 2 * B_pad * (G + Fr) * Hp
            flops += 2 * B_pad * Hp * Hp * self.num_mid
            flops += 2 * B_pad * Hp * Gp
            transc = 2 * B_pad * Hp * self.num_hidden
        bytes_acc = (N_pad * Fr * self.mm_dtype.itemsize + N_pad * 4
                     + B_pad * G * self.mm_dtype.itemsize
                     + B_pad * self.out_pad * 4
                     + sum(int(p.size) * p.dtype.itemsize for p in self.kernel_params))
        return int(flops), int(transc), int(bytes_acc)

    def _vmem_limit(self, TB, TN):
        itm = self.mm_dtype.itemsize
        est = 0
        est += 2 * SUBLANE * TN * 4                    # batch-id chunk (dbl buf)
        est += 2 * self.fr * TN * itm                  # x chunk (dbl buf)
        est += 2 * TB * max(self.global_dim, LANE) * itm
        est += 2 * TB * self.out_pad * 4               # output block
        est += TB * LANE * 4                           # seg accumulator scratch
        for p in self.kernel_params:
            est += _padded_bytes(p)
        est = int(est * 1.5) + (4 << 20)
        # stay under v7x's 64 MiB physical, above v5e's 16 MiB scoped default
        return min(max(est, 32 << 20), 56 << 20)

    # -- forward ------------------------------------------------------------
    def __call__(self, x, edge_index, edge_attr, u, batch):
        # edge_index / edge_attr are unused in the reference forward pass.
        del edge_index, edge_attr
        N = x.shape[0]
        B = u.shape[0]
        G, Fx, Fr = self.global_dim, self.node_dim, self.fr

        # N tiling (lane axis of the transposed x) and B tiling (sublanes).
        TN = min(_round_up(N, LANE), 512)
        N_pad = _round_up(N, TN)
        B_pad = _round_up(B, SUBLANE)
        TB = min(B_pad, 128)
        B_pad = _round_up(B_pad, TB)

        # x^T augmented with a ones row (counts fold into the pooling matmul),
        # lane-dense (N on lanes), zero-padded, cast to the matmul dtype.
        xt = jnp.concatenate(
            [x.astype(jnp.float32).T, jnp.ones((1, N), jnp.float32)], axis=0)
        xt = jnp.pad(xt, ((0, Fr - (Fx + 1)), (0, N_pad - N))).astype(self.mm_dtype)
        batch_row = jnp.pad(batch.astype(jnp.int32), (0, N_pad - N),
                            constant_values=-1).reshape(1, N_pad)
        u_pad = jnp.pad(u.astype(jnp.float32),
                        ((0, B_pad - B), (0, 0))).astype(self.mm_dtype)

        kernel = _make_kernel(
            num_hidden=self.num_hidden, num_mid=self.num_mid,
            hidden_true=self.hidden_dim, count_col=Fx, tb=TB,
            mm_dtype=self.mm_dtype)

        n_params = len(self.kernel_params)
        in_specs = [
            pl.BlockSpec((1, TN), lambda b, n: (0, n)),      # node -> graph ids
            pl.BlockSpec((Fr, TN), lambda b, n: (0, n)),     # [x^T ; 1], lane-dense
            pl.BlockSpec((TB, G), lambda b, n: (b, 0)),      # u
        ] + [pl.BlockSpec(memory_space=pltpu.MemorySpace.VMEM)] * n_params
        out_spec = pl.BlockSpec((TB, self.out_pad), lambda b, n: (b, 0))

        flops, transc, bytes_acc = self._cost(B_pad, N_pad)

        out_padded = pl.pallas_call(
            kernel,
            grid=(B_pad // TB, N_pad // TN),
            in_specs=in_specs,
            out_specs=out_spec,
            out_shape=jax.ShapeDtypeStruct((B_pad, self.out_pad), jnp.float32),
            scratch_shapes=[pltpu.VMEM((TB, Fr), jnp.float32)],
            compiler_params=pltpu.CompilerParams(
                dimension_semantics=("parallel", "arbitrary"),
                vmem_limit_bytes=self._vmem_limit(TB, TN)),
            cost_estimate=pl.CostEstimate(
                flops=flops, transcendentals=transc, bytes_accessed=bytes_acc),
        )(batch_row, xt, u_pad, *self.kernel_params)

        return out_padded[:B, :G]


# ---------------------------------------------------------------------------
# Pure-JAX reference (correctness check only; uses the unpadded f32 params)
# ---------------------------------------------------------------------------
def ref_forward(model, x, u, batch):
    B = u.shape[0]
    seg_sum = jax.ops.segment_sum(x, batch, num_segments=B)
    counts = jax.ops.segment_sum(jnp.ones((x.shape[0],), jnp.float32), batch,
                                 num_segments=B)
    mean = seg_sum / jnp.maximum(counts, 1.0)[:, None]
    h = jnp.concatenate([u, mean], axis=1)
    for (w, b, gamma, beta) in model.hidden_params:
        y = h @ w + b
        y = SELU_SCALE * jnp.where(y > 0, y, SELU_ALPHA * jnp.expm1(y))
        mu = jnp.mean(y, axis=-1, keepdims=True)
        var = jnp.mean((y - mu) ** 2, axis=-1, keepdims=True)
        h = (y - mu) / jnp.sqrt(var + LN_EPS) * gamma + beta
    return h @ model.out_w + model.out_b


if __name__ == "__main__":
    key = jax.random.PRNGKey(0)
    k_x, k_u, k_e, k1, k2, k3, k4 = jax.random.split(key, 7)

    # Small synthetic graph batch: B graphs with uneven sizes (one empty graph
    # exercises the count clamp), N not a multiple of 128, B not a multiple of 8.
    B, Fx, G = 5, 16, 8
    sizes = [10, 8, 14, 0, 8]
    N = sum(sizes)
    batch = jnp.concatenate(
        [jnp.full((s,), i, jnp.int32) for i, s in enumerate(sizes)])
    x = jax.random.normal(k_x, (N, Fx), jnp.float32)
    u = jax.random.normal(k_u, (B, G), jnp.float32)
    E = 20
    edge_index = jax.random.randint(k_e, (2, E), 0, N, jnp.int32)  # unused
    edge_attr = jnp.zeros((E, 4), jnp.float32)                     # unused

    configs = [
        # (hidden_dim, num_layers, matmul_dtype, tolerance)
        (32, 1, jnp.float32, 2e-4),    # single split Linear, strict parity
        (32, 3, jnp.float32, 2e-4),    # stacked-layer fori_loop path, strict parity
        (50, 2, jnp.bfloat16, 1e-1),   # bf16 MXU path
        (50, 4, jnp.bfloat16, 1e-1),   # deep bf16 path
    ]
    for (hd, nl, dt, tol), kk in zip(configs, [k1, k2, k3, k4]):
        model = GlobalMLPModel(global_dim=G, node_dim=Fx, hidden_dim=hd,
                               num_layers=nl, matmul_dtype=dt, key=kk)
        out = jax.block_until_ready(model(x, edge_index, edge_attr, u, batch))
        ref = ref_forward(model, x, u, batch)
        assert out.shape == (B, G)
        assert jnp.allclose(out, ref, atol=tol, rtol=tol), (
            hd, nl, str(dt), float(jnp.max(jnp.abs(out - ref))))

    print("KERNEL_OK")
</pallas_src>

<mosaic_0001>
module attributes {stable_mosaic.version = 11 : i64} {
  func.func @kernel(%arg0: i32, %arg1: i32, %arg2: memref<1x128xi32, #tpu.memory_space<vmem>>, %arg3: memref<24x128xf32, #tpu.memory_space<vmem>>, %arg4: memref<8x8xf32, #tpu.memory_space<vmem>>, %arg5: memref<8x128xf32, #tpu.memory_space<vmem>>, %arg6: memref<24x128xf32, #tpu.memory_space<vmem>>, %arg7: memref<1x128xf32, #tpu.memory_space<vmem>>, %arg8: memref<8x128xf32, #tpu.memory_space<vmem>>, %arg9: memref<8x24xf32, #tpu.memory_space<vmem>>) attributes {dimension_semantics = [#tpu.dimension_semantics<parallel>, #tpu.dimension_semantics<arbitrary>], iteration_bounds = array<i64: 1, 1>, scalar_prefetch = 0 : i64, scratch_operands = 1 : i64, tpu.core_type = #tpu.core_type<tc>, window_params = [{transform_indices = @transform_0, window_bounds = array<i64: 1, 128>}, {transform_indices = @transform_1, window_bounds = array<i64: 24, 128>}, {transform_indices = @transform_2, window_bounds = array<i64: 8, 8>}, {pipeline_mode = #tpu.pipeline_mode<synchronous>, transform_indices = @transform_3, window_bounds = array<i64: 8, 128>}, {pipeline_mode = #tpu.pipeline_mode<synchronous>, transform_indices = @transform_4, window_bounds = array<i64: 24, 128>}, {pipeline_mode = #tpu.pipeline_mode<synchronous>, transform_indices = @transform_5, window_bounds = array<i64: 1, 128>}, {transform_indices = @transform_6, window_bounds = array<i64: 8, 128>}]} {
    %c0_i32 = arith.constant 0 : i32
    %0 = arith.cmpi eq, %arg1, %c0_i32 : i32
    %1 = arith.extui %0 : i1 to i32
    %c0_i32_0 = arith.constant 0 : i32
    %2 = arith.cmpi ne, %1, %c0_i32_0 : i32
    scf.if %2 {
      %cst_10 = arith.constant 0.000000e+00 : f32
      %20 = vector.broadcast %cst_10 : f32 to vector<8x24xf32>
      %c0_11 = arith.constant 0 : index
      %c0_12 = arith.constant 0 : index
      %21 = vector.load %arg9[%c0_11, %c0_12] : memref<8x24xf32, #tpu.memory_space<vmem>>, vector<8x24xf32>
      tpu.vector_store %arg9[%c0_11, %c0_12], %20 {strides = array<i32>} : memref<8x24xf32, #tpu.memory_space<vmem>>, vector<8x24xf32>,
    } else {
    }
    %3 = tpu.iota {dimensions = array<i32: 0>} : vector<8x128xi32>
    %c8_i32 = arith.constant 8 : i32
    %4 = arith.muli %arg0, %c8_i32 : i32
    %5 = vector.broadcast %4 : i32 to vector<8x128xi32>
    %6 = arith.addi %3, %5 : vector<8x128xi32>
    %c0 = arith.constant 0 : index
    %c0_1 = arith.constant 0 : index
    %7 = vector.load %arg2[%c0, %c0_1] : memref<1x128xi32, #tpu.memory_space<vmem>>, vector<1x128xi32>
    %8 = vector.broadcast %7 : vector<1x128xi32> to vector<8x128xi32>
    %9 = arith.cmpi eq, %8, %6 : vector<8x128xi32>
    %10 = arith.extui %9 : vector<8x128xi1> to vector<8x128xi32>
    %11 = arith.sitofp %10 : vector<8x128xi32> to vector<8x128xf32>
    %c0_2 = arith.constant 0 : index
    %c0_3 = arith.constant 0 : index
    %12 = vector.load %arg9[%c0_2, %c0_3] : memref<8x24xf32, #tpu.memory_space<vmem>>, vector<8x24xf32>
    %c0_4 = arith.constant 0 : index
    %c0_5 = arith.constant 0 : index
    %13 = vector.load %arg3[%c0_4, %c0_5] : memref<24x128xf32, #tpu.memory_space<vmem>>, vector<24x128xf32>
    %cst = arith.constant dense<0.000000e+00> : vector<8x24xf32>
    %14 = tpu.matmul %11, %13, %cst {dimension_numbers = #tpu.dot_dimension_numbers<[1], [1], [0], [0], [0, 0, 1, 0], [], []>} : vector<8x128xf32>, vector<24x128xf32>, vector<8x24xf32> -> vector<8x24xf32>
    %15 = arith.addf %12, %14 : vector<8x24xf32>
    %c0_6 = arith.constant 0 : index
    %c0_7 = arith.constant 0 : index
    %16 = vector.load %arg9[%c0_6, %c0_7] : memref<8x24xf32, #tpu.memory_space<vmem>>, vector<8x24xf32>
    tpu.vector_store %arg9[%c0_6, %c0_7], %15 {strides = array<i32>} : memref<8x24xf32, #tpu.memory_space<vmem>>, vector<8x24xf32>,
    %c0_i32_8 = arith.constant 0 : i32
    %17 = arith.cmpi eq, %arg1, %c0_i32_8 : i32
    %18 = arith.extui %17 : i1 to i32
    %c0_i32_9 = arith.constant 0 : i32
    %19 = arith.cmpi ne, %18, %c0_i32_9 : i32
    scf.if %19 {
      %c0_10 = arith.constant 0 : index
      %c0_11 = arith.constant 0 : index
      %20 = vector.load %arg9[%c0_10, %c0_11] : memref<8x24xf32, #tpu.memory_space<vmem>>, vector<8x24xf32>
      %21 = vector.extract_strided_slice %20 {offsets = [0, 16], sizes = [8, 1], strides = [1, 1]} : vector<8x24xf32> to vector<8x1xf32>
      %cst_12 = arith.constant 1.000000e+00 : f32
      %22 = vector.broadcast %cst_12 : f32 to vector<8x1xf32>
      %23 = arith.maximumf %21, %22 : vector<8x1xf32>
      %24 = tpu.reciprocal %23 : vector<8x1xf32> -> vector<8x1xf32>
      %25 = vector.broadcast %24 : vector<8x1xf32> to vector<8x24xf32>
      %26 = arith.mulf %20, %25 : vector<8x24xf32>
      %c0_13 = arith.constant 0 : index
      %c0_14 = arith.constant 0 : index
      %27 = vector.load %arg4[%c0_13, %c0_14] : memref<8x8xf32, #tpu.memory_space<vmem>>, vector<8x8xf32>
      %c0_15 = arith.constant 0 : index
      %c0_16 = arith.constant 0 : index
      %28 = vector.load %arg5[%c0_15, %c0_16] : memref<8x128xf32, #tpu.memory_space<vmem>>, vector<8x128xf32>
      %cst_17 = arith.constant dense<0.000000e+00> : vector<8x128xf32>
      %29 = tpu.matmul %27, %28, %cst_17 {dimension_numbers = #tpu.dot_dimension_numbers<[1], [0], [0], [1], [0, 0, 1, 1], [], []>} : vector<8x8xf32>, vector<8x128xf32>, vector<8x128xf32> -> vector<8x128xf32>
      %c0_18 = arith.constant 0 : index
      %c0_19 = arith.constant 0 : index
      %30 = vector.load %arg6[%c0_18, %c0_19] : memref<24x128xf32, #tpu.memory_space<vmem>>, vector<24x128xf32>
      %cst_20 = arith.constant dense<0.000000e+00> : vector<8x128xf32>
      %31 = tpu.matmul %26, %30, %cst_20 {dimension_numbers = #tpu.dot_dimension_numbers<[1], [0], [0], [1], [0, 0, 1, 1], [], []>} : vector<8x24xf32>, vector<24x128xf32>, vector<8x128xf32> -> vector<8x128xf32>
      %32 = arith.addf %29, %31 : vector<8x128xf32>
      %c0_21 = arith.constant 0 : index
      %c0_22 = arith.constant 0 : index
      %33 = vector.load %arg7[%c0_21, %c0_22] : memref<1x128xf32, #tpu.memory_space<vmem>>, vector<1x128xf32>
      %34 = vector.broadcast %33 : vector<1x128xf32> to vector<8x128xf32>
      %35 = arith.addf %32, %34 : vector<8x128xf32>
      %c0_23 = arith.constant 0 : index
      %c0_24 = arith.constant 0 : index
      %36 = vector.load %arg8[%c0_23, %c0_24] : memref<8x128xf32, #tpu.memory_space<vmem>>, vector<8x128xf32>
      tpu.vector_store %arg8[%c0_23, %c0_24], %35 {strides = array<i32>} : memref<8x128xf32, #tpu.memory_space<vmem>>, vector<8x128xf32>,
    } else {
    }
    return
  }
  func.func @transform_0(%arg0: i32, %arg1: i32) -> (i32, i32) {
    %c0_i32 = arith.constant 0 : i32
    %c0_i32_0 = arith.constant 0 : i32
    return %c0_i32, %arg1 : i32, i32
  }
  func.func @transform_1(%arg0: i32, %arg1: i32) -> (i32, i32) {
    %c0_i32 = arith.constant 0 : i32
    %c0_i32_0 = arith.constant 0 : i32
    return %c0_i32, %arg1 : i32, i32
  }
  func.func @transform_2(%arg0: i32, %arg1: i32) -> (i32, i32) {
    %c0_i32 = arith.constant 0 : i32
    %c0_i32_0 = arith.constant 0 : i32
    return %arg0, %c0_i32 : i32, i32
  }
  func.func @transform_3(%arg0: i32, %arg1: i32) -> (i32, i32) {
    %c0_i32 = arith.constant 0 : i32
    %c0_i32_0 = arith.constant 0 : i32
    %c0_i32_1 = arith.constant 0 : i32
    return %c0_i32, %c0_i32_0 : i32, i32
  }
  func.func @transform_4(%arg0: i32, %arg1: i32) -> (i32, i32) {
    %c0_i32 = arith.constant 0 : i32
    %c0_i32_0 = arith.constant 0 : i32
    %c0_i32_1 = arith.constant 0 : i32
    return %c0_i32, %c0_i32_0 : i32, i32
  }
  func.func @transform_5(%arg0: i32, %arg1: i32) -> (i32, i32) {
    %c0_i32 = arith.constant 0 : i32
    %c0_i32_0 = arith.constant 0 : i32
    %c0_i32_1 = arith.constant 0 : i32
    return %c0_i32, %c0_i32_0 : i32, i32
  }
  func.func @transform_6(%arg0: i32, %arg1: i32) -> (i32, i32) {
    %c0_i32 = arith.constant 0 : i32
    %c0_i32_0 = arith.constant 0 : i32
    return %arg0, %c0_i32 : i32, i32
  }
}

</mosaic_0001>

<bundles_post_ra>
// kernel: tpu_custom_call.1
= control target key start
LH: loop header
LB: loop body
LE: loop exit
PB: predicated region body
PF: predicated region fallthrough
CT: control target
= control target key end

     0   :  { %11 = vsyncpa [#allocation4], 0  ;;  %s634_s0 = inlined_call_operand.hbm [shape: s32[1,128], index: 0, kind: input, shape index: {}]   ;;  %s635_s1 = inlined_call_operand.hbm [shape: f32[24,128], index: 1, kind: input, shape index: {}]   ;;  %s636_s2 = inlined_call_operand.hbm [shape: f32[8,8], index: 2, kind: input, shape index: {}]   ;;  %s637_s3 = inlined_call_operand.hbm [shape: f32[8,128], index: 3, kind: input, shape index: {}]   ;;  %s638_s4 = inlined_call_operand.hbm [shape: f32[24,128], index: 4, kind: input, shape index: {}]   ;;  %s639_s5 = inlined_call_operand.vmem [shape: f32[1,128], index: 5, kind: input, shape index: {}]   ;;  %s640_s6 = inlined_call_operand.hbm [shape: f32[8,128], index: 6, kind: output, shape index: {}]  }
   0x1   :  { %12 = vsyncpa [#allocation7], 0 }
   0x2   :  { %13 = vsyncpa [#allocation10], 0 }
   0x3   :  { %14 = vsyncpa [#allocation5], 0  ;;  %s554_s21 = smov [#allocation6]  }
   0x4   :  { %s30_s22 = sshll.u32 %s554_s21, 4  ;;  %s31_s22 = int_to_ptr.vmem [resolvable:$true] %s30_s22 }
   0x5   :  { %s434_s23 = scalar_lea.vmem %s31_s22, 384  ;;  %p439_p1 = scmp.lt.s32.totalorder %s31_s22, %s31_s22 }
   0x6   :  { %p435_p0 = scmp.ne.s32.totalorder %s31_s22, %s434_s23  ;;  %p440_p2 = scmp.lt.s32.totalorder %s434_s23, %s434_s23 }
   0x8   :  { %p441_p3 = por %p440_p2, %p439_p1 }
   0xa   :  { %p442_p4 = pnand %p441_p3, %p435_p0 }
   0xc   :  { %445 = shalt.err (!%p442_p4)
}
   0xd   :  { %s555_s24 = smov 128   ;;  %s556_s25 = smov 8  }
   0xe   :  { %36 = dma.hbm_to_vmem [thread:$0]  %s635_s1, 384, %s31_s22, [#allocation7], %s555_s24, %s555_s24, %s556_s25  }
   0xf   :  { %s557_s28 = smov [#allocation9]   ;;  %s558_s30 = smov [#allocation3]  }
  0x10   :  { %s53_s29 = sshll.u32 %s557_s28, 4  ;;  %s21_s7 = sshll.u32 %s558_s30, 4  ;;  %s54_s29 = int_to_ptr.vmem [resolvable:$true] %s53_s29  ;;  %s22_s7 = int_to_ptr.vmem [resolvable:$true] %s21_s7 }
  0x11   :  { %s454_s8 = scalar_lea.vmem %s54_s29, 128  ;;  %p459_p6 = scmp.lt.s32.totalorder %s54_s29, %s54_s29 }
  0x12   :  { %p455_p5 = scmp.ne.s32.totalorder %s54_s29, %s454_s8  ;;  %p460_p7 = scmp.lt.s32.totalorder %s454_s8, %s454_s8 }
  0x14   :  { %p461_p8 = por %p460_p7, %p459_p6 }
  0x16   :  { %p462_p9 = pnand %p461_p8, %p455_p5 }
  0x18   :  { %465 = shalt.err (!%p462_p9)
}
  0x19   :  { %56 = dma.hbm_to_vmem [thread:$0]  %s637_s3, 128, %s54_s29, [#allocation10]  }
  0x1a   :  { %s474_s11 = scalar_lea.vmem %s22_s7, 16  ;;  %s478_s1 = scalar_lea.vmem %s22_s7, 32 }
  0x1b   :  { %p475_p10 = scmp.ne.s32.totalorder %s22_s7, %s474_s11  ;;  %p479_p11 = scmp.lt.s32.totalorder %s22_s7, %s22_s7 }
  0x1c   :  { %p480_p12 = scmp.lt.s32.totalorder %s478_s1, %s474_s11 }
  0x1e   :  { %p481_p13 = por %p480_p12, %p479_p11 }
  0x20   :  { %p482_p0 = pnand %p481_p13, %p475_p10 }
  0x22   :  { %485 = shalt.err (!%p482_p0)
}
  0x23   :  { %24 = dma.hbm_to_vmem [thread:$0]  %s634_s0, 16, %s22_s7, [#allocation4]  }
  0x24   :  { %s559_s14 = smov [#allocation8]   ;;  %s560_s16 = smov [#allocation11]  }
  0x25   :  { %s43_s15 = sshll.u32 %s559_s14, 4  ;;  %s62_s17 = sshll.u32 %s560_s16, 4  ;;  %s44_s15 = int_to_ptr.vmem [resolvable:$true] %s43_s15  ;;  %s63_s17 = int_to_ptr.vmem [resolvable:$true] %s62_s17 }
  0x26   :  { %s494_s18 = scalar_lea.vmem %s44_s15, 128  ;;  %p499_p2 = scmp.lt.s32.totalorder %s44_s15, %s44_s15 }
  0x27   :  { %p495_p1 = scmp.ne.s32.totalorder %s44_s15, %s494_s18  ;;  %p500_p3 = scmp.lt.s32.totalorder %s494_s18, %s494_s18 }
  0x29   :  { %p501_p4 = por %p500_p3, %p499_p2 }
  0x2b   :  { %p502_p5 = pnand %p501_p4, %p495_p1 }
  0x2d   :  { %505 = shalt.err (!%p502_p5)
}
  0x2e   :  { %46 = dma.hbm_to_vmem [thread:$0]  %s636_s2, 128, %s44_s15, [#allocation7]  }
  0x2f   :  { %s514_s20 = scalar_lea.vmem %s63_s17, 384  ;;  %p519_p7 = scmp.lt.s32.totalorder %s63_s17, %s63_s17 }
  0x30   :  { %p515_p6 = scmp.ne.s32.totalorder %s63_s17, %s514_s20  ;;  %p520_p8 = scmp.lt.s32.totalorder %s514_s20, %s514_s20 }
  0x32   :  { %p521_p9 = por %p520_p8, %p519_p7 }
  0x34   :  { %p522_p10 = pnand %p521_p9, %p515_p6 }
  0x36   :  { %525 = shalt.err (!%p522_p10)
}
  0x37   :  { %68 = dma.hbm_to_vmem [thread:$0]  %s638_s4, 384, %s63_s17, [#allocation10], %s555_s24, %s555_s24, %s556_s25  }
  0x38   :  { %546 = dma.done.wait [#allocation4], 16  }
  0x39   :  { %547 = vsyncadd [#allocation4], 4294967280 }
  0x3a   :  { %548 = dma.done.wait [#allocation7], 512  }
  0x3b   :  { %549 = vsyncadd [#allocation7], 4294966784 }
  0x3c   :  { %550 = dma.done.wait [#allocation10], 512  }
  0x3d   :  { %551 = vsyncadd [#allocation10], 4294966784  ;;  %v561_v0 = vmov 0.0   ;;  %vm562_vm0 = vmmov 0   ;;  %vm90_vm1 = vcmask 195584   ;;  %v108_v1 = vld [vmem:[#allocation6 + $0x10] sm:$0xff]  ;;  %v92_v2 = vlaneseq }
  0x3e   :  { %388 = vmatprep.subr.mxu0 %v561_v0  ;;  %394 = vmatprep.mubr.msk.f32.mxu0 %vm562_vm0, %v561_v0  ;;  %91 = vst.msk [vmem:[#allocation2] sm:$0xff] %vm90_vm1, %v561_v0  ;;  %v107_v3 = vld [vmem:[#allocation6 + $0x8] sm:$0xff]  ;;  %v106_v5 = vld [vmem:[#allocation6] sm:$0xff]  ;;  %v372_v6 = vld [vmem:[#allocation3] ss:$0 sm:$0xff]  ;;  %v563_v7 = vmov 1.0  }
  0x3f   :  { %397 = vmatprep.subr.mxu1 %v561_v0  ;;  %403 = vmatprep.mubr.msk.f32.mxu1 %vm562_vm0, %v561_v0  ;;  %v93_v4 = vshrl.u32 %v92_v2, 7  ;;  %v564_v8 = vmov 16   ;;  %v198_v9 = vld [vmem:[#allocation11 + $0x10] sm:$0xff]  ;;  %v197_v10 = vld [vmem:[#allocation11 + $0x8] sm:$0xff]  ;;  %v196_v17 = vld [vmem:[#allocation11] sm:$0xff]  ;;  %vm272_vm3 = vcmask 64512  }
  0x40   :  { %389 = vmatpush3.xpose.msra.mxu0 %v108_v1  ;;  %423 = vset.pattern.permute.xlu0 %v564_v8  ;;  %v195_v21 = vld [vmem:[#allocation9] sm:$0xff]  ;;  %v194_v22 = vld [vmem:[#allocation8] sm:$0xff]  ;;  %v377_v26 = vld [vmem:[%s639_s5] ss:$0 sm:$0xff]  ;;  %s565_s22 = smov [#allocation12]  }
  0x41   :  { %390 = vmatprep.subr.mxu0 %v561_v0  ;;  %vm102_vm2 = vcmp.eq.s32.totalorder %v372_v6, %v93_v4  ;;  %398 = vmatpush3.msra.mxu1 %v198_v9  ;;  %s361_s23 = sshll.u32 %s565_s22, 4  ;;  %s362_s23 = int_to_ptr.vmem [resolvable:$true] %s361_s23 }
  0x42   :  { %399 = vmatprep.subr.mxu1 %v561_v0  ;;  %s526_s24 = scalar_lea.vmem %s362_s23, 128  ;;  %p531_p12 = scmp.lt.s32.totalorder %s362_s23, %s362_s23 }
  0x43   :  { %400 = vmatpush3.msra.mxu1 %v197_v10  ;;  %p527_p11 = scmp.ne.s32.totalorder %s362_s23, %s526_s24  ;;  %p532_p13 = scmp.lt.s32.totalorder %s526_s24, %s526_s24 }
  0x44   :  { %391 = vmatpush3.xpose.msra.mxu0 %v107_v3  ;;  %401 = vmatprep.subr.mxu1 %v561_v0 }
  0x45   :  { %392 = vmatprep.subr.mxu0 %v561_v0  ;;  %v105_v11 = vld [vmem:[#allocation2] sm:$0xff]  ;;  %402 = vmatpush3.msra.mxu1 %v196_v17  ;;  %p533_p0 = por %p532_p13, %p531_p12 }
  0x46   :  { %406 = vmatprep.subr.mxu1 %v561_v0 }
  0x47   :  { %p534_p1 = pnand %p533_p0, %p527_p11 }
  0x48   :  { %393 = vmatpush3.xpose.msra.mxu0 %v106_v5 }
  0x4b   :  { %395 = vmatmul.mubr.msk.f32.vlgmr.msra.gmra.mxu0 %vm102_vm2, %v563_v7 }
 0x10b   :  { %v175_v12 = vpop.f32.mrf.mxu0 }
 0x10c   :  { %v179_v13 = vadd.f32 %v175_v12, %v105_v11 }
 0x10d   :  { %v396_v14 = vpop.f32.mrf.mxu0 }
 0x10e   :  { %181 = vst.msk [vmem:[#allocation2] sm:$0xff] %vm90_vm1, %v179_v13 }
 0x115   :  { %v185_v15 = vld [vmem:[#allocation2] sm:$0xff] }
 0x116   :  { %v186_v16 = vmax.f32 %v185_v15, 1.0 }
 0x118   :  { %424 = vrcp.f32 %v186_v16 }
 0x125   :  { %v425_v18 = vpop.eup %424 }
 0x126   :  { %190 = vperm.xlu0 %423, %v425_v18  }
 0x1a1   :  { %v191_v19 = vpop.permute.xlu0 %190 }
 0x1a2   :  { %v193_v20 = vmul.f32 %v191_v19, %v185_v15 }
 0x1a4   :  { %404 = vmatmul.mubr.msk.f32.vlgmr.msra.gmra.mxu1 %vm90_vm1, %v193_v20 }
 0x1a5   :  { %407 = vmatpush3.msra.mxu1 %v195_v21  ;;  %408 = vmatprep.mubr.msk.f32.mxu1 %vm562_vm0, %v561_v0 }
 0x1a8   :  { %409 = vmatmul.mubr.msk.f32.vlgmr.msra.gmra.mxu1 %vm272_vm3, %v194_v22 }
 0x264   :  { %v268_v23 = vpop.f32.mrf.mxu1 }
 0x266   :  { %v405_v24 = vpop.f32.mrf.mxu1 }
 0x268   :  { %v342_v25 = vpop.f32.mrf.mxu1 }
 0x269   :  { %v343_v27 = vadd.f32 %v342_v25, %v268_v23 }
 0x26a   :  { %v410_v28 = vpop.f32.mrf.mxu1 }
 0x26b   :  { %v353_v29 = vadd.f32 %v377_v26, %v343_v27 }
 0x26d   :  { %354 = vst [vmem:[#allocation12] sm:$0xff] %v353_v29 }
 0x26e   :  { %537 = shalt.err (!%p534_p1)
}
 0x26f   :  { %364 = dma.vmem_to_hbm [thread:$0]  %s362_s23, 128, %s640_s6, [#allocation5]  }
 0x270   :  { %552 = dma.done.wait [#allocation5], 128  }
 0x271   :  { %553 = vsyncadd [#allocation5], 4294967168 }
 0x272   :  { %368 = vsyncpa [#allocation4], 1 }
 0x273   :  { %369 = vsyncpa [#allocation7], 1 }
 0x274   :  { %370 = vsyncpa [#allocation10], 1 }
 0x275   :  { %371 = vsyncpa [#allocation5], 1 }

</bundles_post_ra>
